<compile_context>
chip_gen: v7x
topology: tpu7x:2x2x1
jax: 0.10.0
libtpu: 0.0.40
codegen_flags: <defaults>
</compile_context>

<pallas_src>
import jax
import jax.numpy as jnp
from jax import lax
from jax.experimental import pallas as pl
from jax.experimental.pallas import tpu as pltpu


# ----------------------------------------------------------------------------
# Kernel factory: one block of WB windows per grid step.
#   mask_mode: "none"     -> no mask input
#              "folded"   -> bias+mask pre-summed into a (H, nW, N, N) table
#              "separate" -> bias (H,N,N) and mask (nW,N,N) passed separately
# ----------------------------------------------------------------------------
def _make_kernel(*, num_heads, wb, n_tok, nw, mxu_dtype, mask_mode):
    def kernel(*refs):
        if mask_mode == "separate":
            (x_ref, wqkv_ref, bqkv_ref, wproj_ref, bproj_ref,
             bias_ref, mask_ref, o_ref, attn_ref) = refs
        else:
            (x_ref, wqkv_ref, bqkv_ref, wproj_ref, bproj_ref,
             bias_ref, o_ref, attn_ref) = refs

        rows, C = x_ref.shape            # rows = WB * N
        hd = C // num_heads

        # Fused qkv projection on the whole (WB*N, C) slab: bf16 MXU, f32 acc.
        # (qk scale is already folded into the q columns of wqkv/bqkv.)
        # Cast the slab to bf16 once; all per-head slices read the bf16 slab.
        qkv = (jnp.dot(x_ref[...], wqkv_ref[...],
                       preferred_element_type=jnp.float32)
               + bqkv_ref[...]).astype(mxu_dtype)                 # (rows, 3C)

        if mask_mode == "separate":
            mask = mask_ref[...]                                  # (nW, N, N) f32

        for h in range(num_heads):       # static, fully unrolled head loop
            q_h = qkv[:, 0 * C + h * hd:0 * C + (h + 1) * hd].reshape(wb, n_tok, hd)
            k_h = qkv[:, 1 * C + h * hd:1 * C + (h + 1) * hd].reshape(wb, n_tok, hd)
            v_h = qkv[:, 2 * C + h * hd:2 * C + (h + 1) * hd].reshape(wb, n_tok, hd)

            # scores: window axis is a batch dim, contract over hd (no k.T).
            s = lax.dot_general(q_h, k_h, (((2,), (2,)), ((0,), (0,))),
                                preferred_element_type=jnp.float32)   # (WB, N, N)

            if mask_mode == "none":
                s = s + bias_ref[h][None]
            else:
                # Window w of this block uses mask[w % nW]; the block start is a
                # multiple of nW, so reshaping the window axis to (WB//nW, nW)
                # lines the per-window tables up by broadcast (no jnp.tile, and
                # in "folded" mode only ONE add per head touches the scores).
                if mask_mode == "folded":
                    add_h = bias_ref[h]                           # (nW, N, N)
                else:
                    add_h = bias_ref[h][None] + mask              # (nW, N, N)
                s = (s.reshape(wb // nw, nw, n_tok, n_tok)
                     + add_h[None]).reshape(wb, n_tok, n_tok)

            # f32 softmax; the divide goes to the EUP via approx reciprocal.
            s = s - jnp.max(s, axis=-1, keepdims=True)
            p = jnp.exp(s)
            p = p * pl.reciprocal(jnp.sum(p, axis=-1, keepdims=True), approx=True)
            # attn_drop has rate 0.0 -> identity (eval semantics).

            o_h = lax.dot_general(p.astype(mxu_dtype), v_h,
                                  (((2,), (1,)), ((0,), (0,))),
                                  preferred_element_type=jnp.float32)  # (WB, N, hd)

            # Write this head straight into the bf16 VMEM scratch: no head_outs
            # list, no jnp.concatenate relayout; live range bounded per head.
            attn_ref[:, h * hd:(h + 1) * hd] = (
                o_h.reshape(rows, hd).astype(mxu_dtype))

        # Output projection on the full (rows, C) bf16 scratch (proj_drop = 0.0).
        y = jnp.dot(attn_ref[...], wproj_ref[...],
                    preferred_element_type=jnp.float32) + bproj_ref[...]
        o_ref[...] = y.astype(o_ref.dtype)

    return kernel


# ----------------------------------------------------------------------------
# Hardware-aware sizing helpers
# ----------------------------------------------------------------------------
def _tpu_vmem_capacity_bytes():
    """Best-effort per-TensorCore VMEM capacity (fallback: 128 MiB, v5e/v6e)."""
    try:
        return int(pltpu.get_tpu_info().vmem_capacity_bytes)
    except Exception:
        return 128 * 1024 * 1024


def _choose_windows_per_block(B_, N, nW, *, target_rows, min_grid_steps):
    """Largest WB (multiple of nW, dividing B_) with <= target_rows rows that
    still leaves at least `min_grid_steps` grid steps for pipelining/megacore."""
    wb = nW
    while (B_ % (2 * wb) == 0
           and B_ // (2 * wb) >= min_grid_steps
           and 2 * wb * N <= target_rows):
        wb *= 2
    return min(wb, B_)


_FOLD_BIAS_MASK_LIMIT_BYTES = 8 * 1024 * 1024


# ----------------------------------------------------------------------------
# Wrapper
# ----------------------------------------------------------------------------
def window_attention(x, params, rel_bias, mask=None, *,
                     windows_per_block=None, mxu_dtype=jnp.bfloat16,
                     out_dtype=None, fold_bias_mask=None):
    """Swin window attention forward.

    x:        (B_, N, C) with B_ = batch * nW, window index innermost
              (b = batch_idx * nW + window_idx), as produced by window_partition
              in the PyTorch model.  The mask mapping relies on this layout.
    rel_bias: (H, N, N) relative position bias, already gathered per head.
    mask:     (nW, N, N) additive 0/-inf style mask, or None.
    out_dtype: output dtype; defaults to x.dtype.  Pass jnp.bfloat16 to halve
              the output write-back if the consumer tolerates it.
    """
    B_, N, C = x.shape
    H = rel_bias.shape[0]
    hd = C // H
    scale = hd ** (-0.5)
    out_dtype = out_dtype or x.dtype

    # Fold the qk scale into the q columns of the qkv projection (and its bias).
    wqkv = params['wqkv']                                        # (C, 3C)
    bqkv = params['bqkv']                                        # (3C,)
    wqkv = jnp.concatenate([wqkv[:, :C] * scale, wqkv[:, C:]], axis=1)
    bqkv = jnp.concatenate([bqkv[:C] * scale, bqkv[C:]])

    # MXU operands in bf16 (halves weight/x DMA bytes); accumulation & softmax f32.
    x2d = x.reshape(B_ * N, C).astype(mxu_dtype)
    wqkv = wqkv.astype(mxu_dtype)
    wproj = params['wproj'].astype(mxu_dtype)                    # (C, C)
    bqkv = bqkv.reshape(1, 3 * C).astype(jnp.float32)
    bproj = params['bproj'].reshape(1, C).astype(jnp.float32)
    rel_bias = rel_bias.astype(jnp.float32)

    has_mask = mask is not None
    nW = mask.shape[0] if has_mask else 1
    if has_mask:
        assert B_ % nW == 0, "B_ must be a multiple of the number of masks"
        mask = mask.astype(jnp.float32)
        if fold_bias_mask is None:
            fold_bias_mask = nW * H * N * N * 4 <= _FOLD_BIAS_MASK_LIMIT_BYTES
    else:
        fold_bias_mask = False

    if fold_bias_mask:
        # Pre-fold bias + mask into one resident (H, nW, N, N) table.
        bias_arr = rel_bias[:, None, :, :] + mask[None, :, :, :]
        mask_mode = "folded"
    else:
        bias_arr = rel_bias
        mask_mode = "separate" if has_mask else "none"

    # Per-generation sizing: v7x has 64 MiB VMEM per TC and 2 TCs sharing the
    # "parallel" grid axis -> smaller block, >=2 grid steps per core; v5e/v6e
    # (128 MiB, 1 TC) -> grow toward a ~512-row projection LHS.
    vmem_cap = _tpu_vmem_capacity_bytes()
    if vmem_cap <= 64 * 1024 * 1024:
        target_rows, min_grid_steps = 256, 4
    else:
        target_rows, min_grid_steps = 512, 2

    WB = windows_per_block or _choose_windows_per_block(
        B_, N, nW, target_rows=target_rows, min_grid_steps=min_grid_steps)
    assert B_ % WB == 0 and WB % nW == 0, (
        "windows_per_block must divide B_ and be a multiple of nW so every "
        "block starts at a window index that is a multiple of nW (batch-major, "
        "window-innermost layout)")
    rows = WB * N
    grid = (B_ // WB,)

    if bias_arr.ndim == 4:
        bias_spec = pl.BlockSpec((H, nW, N, N), lambda i: (0, 0, 0, 0))
    else:
        bias_spec = pl.BlockSpec((H, N, N), lambda i: (0, 0, 0))

    in_specs = [
        pl.BlockSpec((rows, C), lambda i: (i, 0)),          # x rows
        pl.BlockSpec((C, 3 * C), lambda i: (0, 0)),         # wqkv   (resident)
        pl.BlockSpec((1, 3 * C), lambda i: (0, 0)),         # bqkv   (resident)
        pl.BlockSpec((C, C), lambda i: (0, 0)),             # wproj  (resident)
        pl.BlockSpec((1, C), lambda i: (0, 0)),             # bproj  (resident)
        bias_spec,                                          # bias (+ folded mask)
    ]
    args = [x2d, wqkv, bqkv, wproj, bproj, bias_arr]
    if mask_mode == "separate":
        in_specs.append(pl.BlockSpec((nW, N, N), lambda i: (0, 0, 0)))
        args.append(mask)

    kernel = _make_kernel(num_heads=H, wb=WB, n_tok=N, nw=nW,
                          mxu_dtype=mxu_dtype, mask_mode=mask_mode)

    # Explicit VMEM budget (the demo fits in the 32 MiB scoped default; real
    # Swin widths, e.g. C=768 with rows~512, do not on v7x).
    bf, f32 = 2, 4
    ob = jnp.dtype(out_dtype).itemsize
    live = (2 * rows * C * bf                       # x block, double-buffered
            + 2 * rows * C * ob                     # out block, double-buffered
            + rows * 3 * C * (f32 + bf)             # qkv f32 acc + bf16 slab
            + rows * C * bf                         # attention scratch
            + 4 * WB * N * N * f32                  # score / prob temporaries
            + 2 * (C * 3 * C + C * C) * bf          # weights (double-buffered)
            + 2 * 4 * C * f32                       # projection biases
            + 2 * int(bias_arr.size) * f32          # bias (+mask) table
            + (2 * nW * N * N * f32 if mask_mode == "separate" else 0))
    cap_budget = max(vmem_cap * 3 // 4, 32 * 1024 * 1024)
    vmem_limit = int(min(max(2 * live, 32 * 1024 * 1024), cap_budget))

    # Advisory cost estimate for the XLA scheduler.
    flops = int(B_ * (2 * N * C * 3 * C            # qkv projection
                      + 2 * H * N * N * hd         # QK^T
                      + 2 * H * N * N * hd         # P @ V
                      + 2 * N * C * C))            # output projection
    nbytes = lambda a: int(a.size) * int(a.dtype.itemsize)
    bytes_accessed = int(sum(nbytes(a) for a in args) + B_ * N * C * ob)
    cost = pl.CostEstimate(flops=flops,
                           transcendentals=int(B_ * H * N * N),
                           bytes_accessed=bytes_accessed)

    out2d = pl.pallas_call(
        kernel,
        out_shape=jax.ShapeDtypeStruct((B_ * N, C), out_dtype),
        grid_spec=pltpu.PrefetchScalarGridSpec(
            num_scalar_prefetch=0,
            grid=grid,
            in_specs=in_specs,
            out_specs=pl.BlockSpec((rows, C), lambda i: (i, 0)),
            scratch_shapes=[pltpu.VMEM((rows, C), mxu_dtype)],  # per-head head-out slab
        ),
        compiler_params=pltpu.CompilerParams(
            dimension_semantics=("parallel",),
            vmem_limit_bytes=vmem_limit),
        cost_estimate=cost,
    )(*args)

    return out2d.reshape(B_, N, C)


# ----------------------------------------------------------------------------
# Parameter / buffer construction (deterministic, synthetic)
# ----------------------------------------------------------------------------
def make_relative_position_index(window_size):
    Wh, Ww = window_size
    coords_h = jnp.arange(Wh)
    coords_w = jnp.arange(Ww)
    coords = jnp.stack(jnp.meshgrid(coords_h, coords_w, indexing='ij'))  # (2,Wh,Ww)
    coords_flatten = coords.reshape(2, -1)                               # (2, N)
    rel = coords_flatten[:, :, None] - coords_flatten[:, None, :]        # (2, N, N)
    rel = rel.transpose(1, 2, 0)                                         # (N, N, 2)
    rel = rel.at[:, :, 0].add(Wh - 1)
    rel = rel.at[:, :, 1].add(Ww - 1)
    rel = rel.at[:, :, 0].multiply(2 * Ww - 1)
    return rel.sum(-1)                                                   # (N, N)


def init_params(key, dim, window_size, num_heads):
    Wh, Ww = window_size
    k1, k2, k3, k4, k5, _ = jax.random.split(key, 6)
    # trunc_normal ~ normal for synthetic init
    table = 0.02 * jax.random.normal(
        k1, ((2 * Wh - 1) * (2 * Ww - 1), num_heads), jnp.float32)
    params = {
        'wqkv': 0.05 * jax.random.normal(k2, (dim, 3 * dim), jnp.float32),
        'bqkv': 0.05 * jax.random.normal(k3, (3 * dim,), jnp.float32),
        'wproj': 0.05 * jax.random.normal(k4, (dim, dim), jnp.float32),
        'bproj': 0.05 * jax.random.normal(k5, (dim,), jnp.float32),
    }
    rel_index = make_relative_position_index(window_size)               # (N, N)
    N = Wh * Ww
    rel_bias = table[rel_index.reshape(-1)].reshape(N, N, num_heads)
    rel_bias = rel_bias.transpose(2, 0, 1)                              # (H, N, N)
    return params, rel_bias


# ----------------------------------------------------------------------------
# Pure-JAX reference (mirrors the PyTorch forward) for a correctness check
# ----------------------------------------------------------------------------
def reference(x, params, rel_bias, num_heads, mask=None):
    B_, N, C = x.shape
    hd = C // num_heads
    scale = hd ** (-0.5)
    qkv = x @ params['wqkv'] + params['bqkv']
    qkv = qkv.reshape(B_, N, 3, num_heads, hd).transpose(2, 0, 3, 1, 4)
    q, k, v = qkv[0], qkv[1], qkv[2]
    q = q * scale
    attn = jnp.einsum('bhqd,bhkd->bhqk', q, k)
    attn = attn + rel_bias[None]
    if mask is not None:
        nW = mask.shape[0]
        attn = attn.reshape(B_ // nW, nW, num_heads, N, N) + mask[None, :, None]
        attn = attn.reshape(-1, num_heads, N, N)
    attn = jax.nn.softmax(attn, axis=-1)
    out = jnp.einsum('bhqk,bhkd->bhqd', attn, v).transpose(0, 2, 1, 3).reshape(B_, N, C)
    return out @ params['wproj'] + params['bproj']


if __name__ == "__main__":
    dim = 32
    window_size = (4, 4)          # N = 16 tokens per window
    num_heads = 4
    batch = 2
    nW = 2                        # number of distinct windows (for the mask)
    B_ = batch * nW
    N = window_size[0] * window_size[1]

    key = jax.random.PRNGKey(0)
    kp, kx, km = jax.random.split(key, 3)
    params, rel_bias = init_params(kp, dim, window_size, num_heads)

    x = jax.random.normal(kx, (B_, N, dim), jnp.float32)
    # 0 / -100 shifted-window style mask
    mask = jnp.where(jax.random.bernoulli(km, 0.2, (nW, N, N)),
                     jnp.float32(-100.0), jnp.float32(0.0))

    ref = reference(x, params, rel_bias, num_heads, mask)
    ref_nm = reference(x, params, rel_bias, num_heads, None)

    # masked path (default: bias+mask pre-folded into one table)
    out = jax.block_until_ready(window_attention(x, params, rel_bias, mask))
    assert out.shape == (B_, N, dim)
    assert float(jnp.max(jnp.abs(out - ref))) < 2e-2, "mismatch vs reference (mask, folded)"

    # masked path, separate bias / mask kernel variant (large-table fallback)
    out_sep = jax.block_until_ready(
        window_attention(x, params, rel_bias, mask, fold_bias_mask=False))
    assert float(jnp.max(jnp.abs(out_sep - ref))) < 2e-2, "mismatch vs reference (mask, separate)"

    # mask=None specialization
    out_nm = jax.block_until_ready(window_attention(x, params, rel_bias, None))
    assert float(jnp.max(jnp.abs(out_nm - ref_nm))) < 2e-2, "mismatch vs reference (no mask)"

    print("KERNEL_OK")
</pallas_src>

<mosaic_0001>
module attributes {stable_mosaic.version = 11 : i64} {
  func.func @kernel(%arg0: i32, %arg1: memref<32x32xbf16, #tpu.memory_space<vmem>>, %arg2: memref<32x96xbf16, #tpu.memory_space<vmem>>, %arg3: memref<1x96xf32, #tpu.memory_space<vmem>>, %arg4: memref<32x32xbf16, #tpu.memory_space<vmem>>, %arg5: memref<1x32xf32, #tpu.memory_space<vmem>>, %arg6: memref<4x2x16x16xf32, #tpu.memory_space<vmem>>, %arg7: memref<32x32xf32, #tpu.memory_space<vmem>>, %arg8: memref<32x32xbf16, #tpu.memory_space<vmem>>) attributes {dimension_semantics = [#tpu.dimension_semantics<parallel>], iteration_bounds = array<i64: 2>, scalar_prefetch = 0 : i64, scratch_operands = 1 : i64, tpu.core_type = #tpu.core_type<tc>, window_params = [{transform_indices = @transform_0, window_bounds = array<i64: 32, 32>}, {pipeline_mode = #tpu.pipeline_mode<synchronous>, transform_indices = @transform_1, window_bounds = array<i64: 32, 96>}, {pipeline_mode = #tpu.pipeline_mode<synchronous>, transform_indices = @transform_2, window_bounds = array<i64: 1, 96>}, {pipeline_mode = #tpu.pipeline_mode<synchronous>, transform_indices = @transform_3, window_bounds = array<i64: 32, 32>}, {pipeline_mode = #tpu.pipeline_mode<synchronous>, transform_indices = @transform_4, window_bounds = array<i64: 1, 32>}, {pipeline_mode = #tpu.pipeline_mode<synchronous>, transform_indices = @transform_5, window_bounds = array<i64: 4, 2, 16, 16>}, {transform_indices = @transform_6, window_bounds = array<i64: 32, 32>}]} {
    %c0 = arith.constant 0 : index
    %c0_0 = arith.constant 0 : index
    %0 = vector.load %arg1[%c0, %c0_0] : memref<32x32xbf16, #tpu.memory_space<vmem>>, vector<32x32xbf16>
    %c0_1 = arith.constant 0 : index
    %c0_2 = arith.constant 0 : index
    %1 = vector.load %arg2[%c0_1, %c0_2] : memref<32x96xbf16, #tpu.memory_space<vmem>>, vector<32x96xbf16>
    %cst = arith.constant dense<0.000000e+00> : vector<32x96xf32>
    %2 = tpu.matmul %0, %1, %cst {dimension_numbers = #tpu.dot_dimension_numbers<[1], [0], [0], [1], [0, 0, 1, 1], [], []>} : vector<32x32xbf16>, vector<32x96xbf16>, vector<32x96xf32> -> vector<32x96xf32>
    %c0_3 = arith.constant 0 : index
    %c0_4 = arith.constant 0 : index
    %3 = vector.load %arg3[%c0_3, %c0_4] : memref<1x96xf32, #tpu.memory_space<vmem>>, vector<1x96xf32>
    %4 = vector.broadcast %3 : vector<1x96xf32> to vector<32x96xf32>
    %5 = arith.addf %2, %4 : vector<32x96xf32>
    %6 = arith.truncf %5 : vector<32x96xf32> to vector<32x96xbf16>
    %7 = vector.extract_strided_slice %6 {offsets = [0, 0], sizes = [32, 8], strides = [1, 1]} : vector<32x96xbf16> to vector<32x8xbf16>
    %8 = vector.shape_cast %7 : vector<32x8xbf16> to vector<2x16x8xbf16>
    %9 = vector.extract_strided_slice %6 {offsets = [0, 32], sizes = [32, 8], strides = [1, 1]} : vector<32x96xbf16> to vector<32x8xbf16>
    %10 = vector.shape_cast %9 : vector<32x8xbf16> to vector<2x16x8xbf16>
    %11 = vector.extract_strided_slice %6 {offsets = [0, 64], sizes = [32, 8], strides = [1, 1]} : vector<32x96xbf16> to vector<32x8xbf16>
    %12 = vector.shape_cast %11 : vector<32x8xbf16> to vector<2x16x8xbf16>
    %cst_5 = arith.constant dense<0.000000e+00> : vector<2x16x16xf32>
    %13 = tpu.matmul %8, %10, %cst_5 {dimension_numbers = #tpu.dot_dimension_numbers<[2], [2], [1], [1], [0, 0, 0, 1, 1, 1], [0], [0]>} : vector<2x16x8xbf16>, vector<2x16x8xbf16>, vector<2x16x16xf32> -> vector<2x16x16xf32>
    %c0_6 = arith.constant 0 : index
    %c0_7 = arith.constant 0 : index
    %c0_8 = arith.constant 0 : index
    %c0_9 = arith.constant 0 : index
    %14 = vector.load %arg6[%c0_6, %c0_7, %c0_8, %c0_9] : memref<4x2x16x16xf32, #tpu.memory_space<vmem>>, vector<1x2x16x16xf32>
    %15 = vector.shape_cast %14 : vector<1x2x16x16xf32> to vector<2x16x16xf32>
    %16 = vector.shape_cast %13 : vector<2x16x16xf32> to vector<1x2x16x16xf32>
    %17 = vector.shape_cast %15 : vector<2x16x16xf32> to vector<1x2x16x16xf32>
    %18 = arith.addf %16, %17 : vector<1x2x16x16xf32>
    %19 = vector.shape_cast %18 : vector<1x2x16x16xf32> to vector<2x16x16xf32>
    %cst_10 = arith.constant dense<0xFF800000> : vector<2x16xf32>
    %20 = vector.multi_reduction <maximumf>, %19, %cst_10 [2] : vector<2x16x16xf32> to vector<2x16xf32>
    %21 = vector.shape_cast %20 : vector<2x16xf32> to vector<2x16x1xf32>
    %22 = vector.broadcast %21 : vector<2x16x1xf32> to vector<2x16x16xf32>
    %23 = arith.subf %19, %22 : vector<2x16x16xf32>
    %24 = math.exp %23 : vector<2x16x16xf32>
    %cst_11 = arith.constant dense<0.000000e+00> : vector<2x16xf32>
    %25 = vector.multi_reduction <add>, %24, %cst_11 [2] : vector<2x16x16xf32> to vector<2x16xf32>
    %26 = vector.shape_cast %25 : vector<2x16xf32> to vector<2x16x1xf32>
    %27 = tpu.reciprocal %26 {approx = true} : vector<2x16x1xf32> -> vector<2x16x1xf32>
    %28 = vector.broadcast %27 : vector<2x16x1xf32> to vector<2x16x16xf32>
    %29 = arith.mulf %24, %28 : vector<2x16x16xf32>
    %30 = arith.truncf %29 : vector<2x16x16xf32> to vector<2x16x16xbf16>
    %cst_12 = arith.constant dense<0.000000e+00> : vector<2x16x8xf32>
    %31 = tpu.matmul %30, %12, %cst_12 {dimension_numbers = #tpu.dot_dimension_numbers<[2], [1], [1], [2], [0, 0, 0, 1, 1, 2], [0], [0]>} : vector<2x16x16xbf16>, vector<2x16x8xbf16>, vector<2x16x8xf32> -> vector<2x16x8xf32>
    %32 = vector.shape_cast %31 : vector<2x16x8xf32> to vector<32x8xf32>
    %33 = arith.truncf %32 : vector<32x8xf32> to vector<32x8xbf16>
    %c0_13 = arith.constant 0 : index
    %c0_14 = arith.constant 0 : index
    %34 = vector.load %arg8[%c0_13, %c0_14] : memref<32x32xbf16, #tpu.memory_space<vmem>>, vector<32x8xbf16>
    tpu.vector_store %arg8[%c0_13, %c0_14], %33 {strides = array<i32>} : memref<32x32xbf16, #tpu.memory_space<vmem>>, vector<32x8xbf16>,
    %35 = vector.extract_strided_slice %6 {offsets = [0, 8], sizes = [32, 8], strides = [1, 1]} : vector<32x96xbf16> to vector<32x8xbf16>
    %36 = vector.shape_cast %35 : vector<32x8xbf16> to vector<2x16x8xbf16>
    %37 = vector.extract_strided_slice %6 {offsets = [0, 40], sizes = [32, 8], strides = [1, 1]} : vector<32x96xbf16> to vector<32x8xbf16>
    %38 = vector.shape_cast %37 : vector<32x8xbf16> to vector<2x16x8xbf16>
    %39 = vector.extract_strided_slice %6 {offsets = [0, 72], sizes = [32, 8], strides = [1, 1]} : vector<32x96xbf16> to vector<32x8xbf16>
    %40 = vector.shape_cast %39 : vector<32x8xbf16> to vector<2x16x8xbf16>
    %cst_15 = arith.constant dense<0.000000e+00> : vector<2x16x16xf32>
    %41 = tpu.matmul %36, %38, %cst_15 {dimension_numbers = #tpu.dot_dimension_numbers<[2], [2], [1], [1], [0, 0, 0, 1, 1, 1], [0], [0]>} : vector<2x16x8xbf16>, vector<2x16x8xbf16>, vector<2x16x16xf32> -> vector<2x16x16xf32>
    %c1 = arith.constant 1 : index
    %c0_16 = arith.constant 0 : index
    %c0_17 = arith.constant 0 : index
    %c0_18 = arith.constant 0 : index
    %42 = vector.load %arg6[%c1, %c0_16, %c0_17, %c0_18] : memref<4x2x16x16xf32, #tpu.memory_space<vmem>>, vector<1x2x16x16xf32>
    %43 = vector.shape_cast %42 : vector<1x2x16x16xf32> to vector<2x16x16xf32>
    %44 = vector.shape_cast %41 : vector<2x16x16xf32> to vector<1x2x16x16xf32>
    %45 = vector.shape_cast %43 : vector<2x16x16xf32> to vector<1x2x16x16xf32>
    %46 = arith.addf %44, %45 : vector<1x2x16x16xf32>
    %47 = vector.shape_cast %46 : vector<1x2x16x16xf32> to vector<2x16x16xf32>
    %cst_19 = arith.constant dense<0xFF800000> : vector<2x16xf32>
    %48 = vector.multi_reduction <maximumf>, %47, %cst_19 [2] : vector<2x16x16xf32> to vector<2x16xf32>
    %49 = vector.shape_cast %48 : vector<2x16xf32> to vector<2x16x1xf32>
    %50 = vector.broadcast %49 : vector<2x16x1xf32> to vector<2x16x16xf32>
    %51 = arith.subf %47, %50 : vector<2x16x16xf32>
    %52 = math.exp %51 : vector<2x16x16xf32>
    %cst_20 = arith.constant dense<0.000000e+00> : vector<2x16xf32>
    %53 = vector.multi_reduction <add>, %52, %cst_20 [2] : vector<2x16x16xf32> to vector<2x16xf32>
    %54 = vector.shape_cast %53 : vector<2x16xf32> to vector<2x16x1xf32>
    %55 = tpu.reciprocal %54 {approx = true} : vector<2x16x1xf32> -> vector<2x16x1xf32>
    %56 = vector.broadcast %55 : vector<2x16x1xf32> to vector<2x16x16xf32>
    %57 = arith.mulf %52, %56 : vector<2x16x16xf32>
    %58 = arith.truncf %57 : vector<2x16x16xf32> to vector<2x16x16xbf16>
    %cst_21 = arith.constant dense<0.000000e+00> : vector<2x16x8xf32>
    %59 = tpu.matmul %58, %40, %cst_21 {dimension_numbers = #tpu.dot_dimension_numbers<[2], [1], [1], [2], [0, 0, 0, 1, 1, 2], [0], [0]>} : vector<2x16x16xbf16>, vector<2x16x8xbf16>, vector<2x16x8xf32> -> vector<2x16x8xf32>
    %60 = vector.shape_cast %59 : vector<2x16x8xf32> to vector<32x8xf32>
    %61 = arith.truncf %60 : vector<32x8xf32> to vector<32x8xbf16>
    %c0_22 = arith.constant 0 : index
    %c8 = arith.constant 8 : index
    %62 = vector.load %arg8[%c0_22, %c8] : memref<32x32xbf16, #tpu.memory_space<vmem>>, vector<32x8xbf16>
    tpu.vector_store %arg8[%c0_22, %c8], %61 {strides = array<i32>} : memref<32x32xbf16, #tpu.memory_space<vmem>>, vector<32x8xbf16>,
    %63 = vector.extract_strided_slice %6 {offsets = [0, 16], sizes = [32, 8], strides = [1, 1]} : vector<32x96xbf16> to vector<32x8xbf16>
    %64 = vector.shape_cast %63 : vector<32x8xbf16> to vector<2x16x8xbf16>
    %65 = vector.extract_strided_slice %6 {offsets = [0, 48], sizes = [32, 8], strides = [1, 1]} : vector<32x96xbf16> to vector<32x8xbf16>
    %66 = vector.shape_cast %65 : vector<32x8xbf16> to vector<2x16x8xbf16>
    %67 = vector.extract_strided_slice %6 {offsets = [0, 80], sizes = [32, 8], strides = [1, 1]} : vector<32x96xbf16> to vector<32x8xbf16>
    %68 = vector.shape_cast %67 : vector<32x8xbf16> to vector<2x16x8xbf16>
    %cst_23 = arith.constant dense<0.000000e+00> : vector<2x16x16xf32>
    %69 = tpu.matmul %64, %66, %cst_23 {dimension_numbers = #tpu.dot_dimension_numbers<[2], [2], [1], [1], [0, 0, 0, 1, 1, 1], [0], [0]>} : vector<2x16x8xbf16>, vector<2x16x8xbf16>, vector<2x16x16xf32> -> vector<2x16x16xf32>
    %c2 = arith.constant 2 : index
    %c0_24 = arith.constant 0 : index
    %c0_25 = arith.constant 0 : index
    %c0_26 = arith.constant 0 : index
    %70 = vector.load %arg6[%c2, %c0_24, %c0_25, %c0_26] : memref<4x2x16x16xf32, #tpu.memory_space<vmem>>, vector<1x2x16x16xf32>
    %71 = vector.shape_cast %70 : vector<1x2x16x16xf32> to vector<2x16x16xf32>
    %72 = vector.shape_cast %69 : vector<2x16x16xf32> to vector<1x2x16x16xf32>
    %73 = vector.shape_cast %71 : vector<2x16x16xf32> to vector<1x2x16x16xf32>
    %74 = arith.addf %72, %73 : vector<1x2x16x16xf32>
    %75 = vector.shape_cast %74 : vector<1x2x16x16xf32> to vector<2x16x16xf32>
    %cst_27 = arith.constant dense<0xFF800000> : vector<2x16xf32>
    %76 = vector.multi_reduction <maximumf>, %75, %cst_27 [2] : vector<2x16x16xf32> to vector<2x16xf32>
    %77 = vector.shape_cast %76 : vector<2x16xf32> to vector<2x16x1xf32>
    %78 = vector.broadcast %77 : vector<2x16x1xf32> to vector<2x16x16xf32>
    %79 = arith.subf %75, %78 : vector<2x16x16xf32>
    %80 = math.exp %79 : vector<2x16x16xf32>
    %cst_28 = arith.constant dense<0.000000e+00> : vector<2x16xf32>
    %81 = vector.multi_reduction <add>, %80, %cst_28 [2] : vector<2x16x16xf32> to vector<2x16xf32>
    %82 = vector.shape_cast %81 : vector<2x16xf32> to vector<2x16x1xf32>
    %83 = tpu.reciprocal %82 {approx = true} : vector<2x16x1xf32> -> vector<2x16x1xf32>
    %84 = vector.broadcast %83 : vector<2x16x1xf32> to vector<2x16x16xf32>
    %85 = arith.mulf %80, %84 : vector<2x16x16xf32>
    %86 = arith.truncf %85 : vector<2x16x16xf32> to vector<2x16x16xbf16>
    %cst_29 = arith.constant dense<0.000000e+00> : vector<2x16x8xf32>
    %87 = tpu.matmul %86, %68, %cst_29 {dimension_numbers = #tpu.dot_dimension_numbers<[2], [1], [1], [2], [0, 0, 0, 1, 1, 2], [0], [0]>} : vector<2x16x16xbf16>, vector<2x16x8xbf16>, vector<2x16x8xf32> -> vector<2x16x8xf32>
    %88 = vector.shape_cast %87 : vector<2x16x8xf32> to vector<32x8xf32>
    %89 = arith.truncf %88 : vector<32x8xf32> to vector<32x8xbf16>
    %c0_30 = arith.constant 0 : index
    %c16 = arith.constant 16 : index
    %90 = vector.load %arg8[%c0_30, %c16] : memref<32x32xbf16, #tpu.memory_space<vmem>>, vector<32x8xbf16>
    tpu.vector_store %arg8[%c0_30, %c16], %89 {strides = array<i32>} : memref<32x32xbf16, #tpu.memory_space<vmem>>, vector<32x8xbf16>,
    %91 = vector.extract_strided_slice %6 {offsets = [0, 24], sizes = [32, 8], strides = [1, 1]} : vector<32x96xbf16> to vector<32x8xbf16>
    %92 = vector.shape_cast %91 : vector<32x8xbf16> to vector<2x16x8xbf16>
    %93 = vector.extract_strided_slice %6 {offsets = [0, 56], sizes = [32, 8], strides = [1, 1]} : vector<32x96xbf16> to vector<32x8xbf16>
    %94 = vector.shape_cast %93 : vector<32x8xbf16> to vector<2x16x8xbf16>
    %95 = vector.extract_strided_slice %6 {offsets = [0, 88], sizes = [32, 8], strides = [1, 1]} : vector<32x96xbf16> to vector<32x8xbf16>
    %96 = vector.shape_cast %95 : vector<32x8xbf16> to vector<2x16x8xbf16>
    %cst_31 = arith.constant dense<0.000000e+00> : vector<2x16x16xf32>
    %97 = tpu.matmul %92, %94, %cst_31 {dimension_numbers = #tpu.dot_dimension_numbers<[2], [2], [1], [1], [0, 0, 0, 1, 1, 1], [0], [0]>} : vector<2x16x8xbf16>, vector<2x16x8xbf16>, vector<2x16x16xf32> -> vector<2x16x16xf32>
    %c3 = arith.constant 3 : index
    %c0_32 = arith.constant 0 : index
    %c0_33 = arith.constant 0 : index
    %c0_34 = arith.constant 0 : index
    %98 = vector.load %arg6[%c3, %c0_32, %c0_33, %c0_34] : memref<4x2x16x16xf32, #tpu.memory_space<vmem>>, vector<1x2x16x16xf32>
    %99 = vector.shape_cast %98 : vector<1x2x16x16xf32> to vector<2x16x16xf32>
    %100 = vector.shape_cast %97 : vector<2x16x16xf32> to vector<1x2x16x16xf32>
    %101 = vector.shape_cast %99 : vector<2x16x16xf32> to vector<1x2x16x16xf32>
    %102 = arith.addf %100, %101 : vector<1x2x16x16xf32>
    %103 = vector.shape_cast %102 : vector<1x2x16x16xf32> to vector<2x16x16xf32>
    %cst_35 = arith.constant dense<0xFF800000> : vector<2x16xf32>
    %104 = vector.multi_reduction <maximumf>, %103, %cst_35 [2] : vector<2x16x16xf32> to vector<2x16xf32>
    %105 = vector.shape_cast %104 : vector<2x16xf32> to vector<2x16x1xf32>
    %106 = vector.broadcast %105 : vector<2x16x1xf32> to vector<2x16x16xf32>
    %107 = arith.subf %103, %106 : vector<2x16x16xf32>
    %108 = math.exp %107 : vector<2x16x16xf32>
    %cst_36 = arith.constant dense<0.000000e+00> : vector<2x16xf32>
    %109 = vector.multi_reduction <add>, %108, %cst_36 [2] : vector<2x16x16xf32> to vector<2x16xf32>
    %110 = vector.shape_cast %109 : vector<2x16xf32> to vector<2x16x1xf32>
    %111 = tpu.reciprocal %110 {approx = true} : vector<2x16x1xf32> -> vector<2x16x1xf32>
    %112 = vector.broadcast %111 : vector<2x16x1xf32> to vector<2x16x16xf32>
    %113 = arith.mulf %108, %112 : vector<2x16x16xf32>
    %114 = arith.truncf %113 : vector<2x16x16xf32> to vector<2x16x16xbf16>
    %cst_37 = arith.constant dense<0.000000e+00> : vector<2x16x8xf32>
    %115 = tpu.matmul %114, %96, %cst_37 {dimension_numbers = #tpu.dot_dimension_numbers<[2], [1], [1], [2], [0, 0, 0, 1, 1, 2], [0], [0]>} : vector<2x16x16xbf16>, vector<2x16x8xbf16>, vector<2x16x8xf32> -> vector<2x16x8xf32>
    %116 = vector.shape_cast %115 : vector<2x16x8xf32> to vector<32x8xf32>
    %117 = arith.truncf %116 : vector<32x8xf32> to vector<32x8xbf16>
    %c0_38 = arith.constant 0 : index
    %c24 = arith.constant 24 : index
    %118 = vector.load %arg8[%c0_38, %c24] : memref<32x32xbf16, #tpu.memory_space<vmem>>, vector<32x8xbf16>
    tpu.vector_store %arg8[%c0_38, %c24], %117 {strides = array<i32>} : memref<32x32xbf16, #tpu.memory_space<vmem>>, vector<32x8xbf16>,
    %c0_39 = arith.constant 0 : index
    %c0_40 = arith.constant 0 : index
    %119 = vector.load %arg8[%c0_39, %c0_40] : memref<32x32xbf16, #tpu.memory_space<vmem>>, vector<32x32xbf16>
    %c0_41 = arith.constant 0 : index
    %c0_42 = arith.constant 0 : index
    %120 = vector.load %arg4[%c0_41, %c0_42] : memref<32x32xbf16, #tpu.memory_space<vmem>>, vector<32x32xbf16>
    %cst_43 = arith.constant dense<0.000000e+00> : vector<32x32xf32>
    %121 = tpu.matmul %119, %120, %cst_43 {dimension_numbers = #tpu.dot_dimension_numbers<[1], [0], [0], [1], [0, 0, 1, 1], [], []>} : vector<32x32xbf16>, vector<32x32xbf16>, vector<32x32xf32> -> vector<32x32xf32>
    %c0_44 = arith.constant 0 : index
    %c0_45 = arith.constant 0 : index
    %122 = vector.load %arg5[%c0_44, %c0_45] : memref<1x32xf32, #tpu.memory_space<vmem>>, vector<1x32xf32>
    %123 = vector.broadcast %122 : vector<1x32xf32> to vector<32x32xf32>
    %124 = arith.addf %121, %123 : vector<32x32xf32>
    %c0_46 = arith.constant 0 : index
    %c0_47 = arith.constant 0 : index
    %125 = vector.load %arg7[%c0_46, %c0_47] : memref<32x32xf32, #tpu.memory_space<vmem>>, vector<32x32xf32>
    tpu.vector_store %arg7[%c0_46, %c0_47], %124 {strides = array<i32>} : memref<32x32xf32, #tpu.memory_space<vmem>>, vector<32x32xf32>,
    return
  }
  func.func @transform_0(%arg0: i32) -> (i32, i32) {
    %c0_i32 = arith.constant 0 : i32
    %c0_i32_0 = arith.constant 0 : i32
    return %arg0, %c0_i32 : i32, i32
  }
  func.func @transform_1(%arg0: i32) -> (i32, i32) {
    %c0_i32 = arith.constant 0 : i32
    %c0_i32_0 = arith.constant 0 : i32
    %c0_i32_1 = arith.constant 0 : i32
    return %c0_i32, %c0_i32_0 : i32, i32
  }
  func.func @transform_2(%arg0: i32) -> (i32, i32) {
    %c0_i32 = arith.constant 0 : i32
    %c0_i32_0 = arith.constant 0 : i32
    %c0_i32_1 = arith.constant 0 : i32
    return %c0_i32, %c0_i32_0 : i32, i32
  }
  func.func @transform_3(%arg0: i32) -> (i32, i32) {
    %c0_i32 = arith.constant 0 : i32
    %c0_i32_0 = arith.constant 0 : i32
    %c0_i32_1 = arith.constant 0 : i32
    return %c0_i32, %c0_i32_0 : i32, i32
  }
  func.func @transform_4(%arg0: i32) -> (i32, i32) {
    %c0_i32 = arith.constant 0 : i32
    %c0_i32_0 = arith.constant 0 : i32
    %c0_i32_1 = arith.constant 0 : i32
    return %c0_i32, %c0_i32_0 : i32, i32
  }
  func.func @transform_5(%arg0: i32) -> (i32, i32, i32, i32) {
    %c0_i32 = arith.constant 0 : i32
    %c0_i32_0 = arith.constant 0 : i32
    %c0_i32_1 = arith.constant 0 : i32
    %c0_i32_2 = arith.constant 0 : i32
    %c0_i32_3 = arith.constant 0 : i32
    return %c0_i32, %c0_i32_0, %c0_i32_1, %c0_i32_2 : i32, i32, i32, i32
  }
  func.func @transform_6(%arg0: i32) -> (i32, i32) {
    %c0_i32 = arith.constant 0 : i32
    %c0_i32_0 = arith.constant 0 : i32
    return %arg0, %c0_i32 : i32, i32
  }
}

</mosaic_0001>

<bundles_post_ra>
// kernel: tpu_custom_call.1
= control target key start
LH: loop header
LB: loop body
LE: loop exit
PB: predicated region body
PF: predicated region fallthrough
CT: control target
= control target key end

     0   :  { %11 = vsyncpa [#allocation4], 0  ;;  %s1958_s21 = smov 0   ;;  %s2218_s0 = inlined_call_operand.vmem [shape: bf16[64,32], index: 0, kind: input, shape index: {}]   ;;  %s2219_s1 = inlined_call_operand.vmem [shape: bf16[32,96], index: 1, kind: input, shape index: {}]   ;;  %s2220_s2 = inlined_call_operand.vmem [shape: f32[1,96], index: 2, kind: input, shape index: {}]   ;;  %s2221_s3 = inlined_call_operand.vmem [shape: bf16[32,32], index: 3, kind: input, shape index: {}]   ;;  %s2222_s4 = inlined_call_operand.vmem [shape: f32[1,32], index: 4, kind: input, shape index: {}]   ;;  %s2223_s5 = inlined_call_operand.hbm [shape: f32[4,2,16,16], index: 5, kind: input, shape index: {}]   ;;  %s2224_s6 = inlined_call_operand.vmem [shape: f32[64,32], index: 6, kind: output, shape index: {}]  }
   0x1 LB: > { %s1564_s22 = sadd.s32 4294967295, %s1902_s21   ;;  %p1566_p0 = scmp.ge.s32.totalorder %s1902_s21, 1  ;;  %s1902_s21 = sphi %s1958_s21, %s17_s21  }
   0x2   : > { %p179_p1 = scmp.lt.s32.totalorder %s1902_s21, 3  ;;  %s1904_s23 = smov [#allocation3]  }
   0x3   : > { %s203_s24 = sshll.u32 %s1904_s23, 4  ;;  %p1972_p3 = scmp.eq.s32.totalorder %s1564_s22, 0  ;;  %s204_s24 = int_to_ptr.vmem [resolvable:$true] %s203_s24 }
   0x4   : > { %p1966_p2 = pnand %p1566_p0, %p179_p1  ;;  %s1864_s30 = scalar_lea.hbm %s2223_s5, 2048 }
   0x5   : > { %s2229_s26 = scalar_select %p1972_p3, 1, 0 }
   0x6   : > { %s2228_s25 = scalar_select %p1966_p2, 1, 0 }
   0x7   : > { %p1761_p4 = pneg %p1966_p2  ;;  %p1865_p6 = scmp.ne.s32.totalorder %s2223_s5, %s1864_s30 }
   0x8   : > { %p1871_p10 = scmp.lt.u32.totalorder %s1864_s30, %s2223_s5 }
   0x9   : > { %p1980_p5 = pnand %p1972_p3, %p1761_p4 }
   0xb   : > { %p1866_p7 = pneg %p1980_p5 }
   0xd   : > { %p1867_p8 = pnand %p1866_p7, %p1865_p6 }
   0xf   : > { %p1868_p9 = pneg %p1867_p8 }
  0x11   : > { %p1873_p11 = pnand %p1871_p10, %p1868_p9 }
  0x13   : > { %1876 = shalt.err (!%p1873_p11)
}
  0x14   : > { %s1877_s11 = scalar_lea.vmem %s204_s24, 2048  ;;  %p1885_p1 = scmp.lt.s32.totalorder %s204_s24, %s204_s24 }
  0x15   : > { %p1878_p12 = scmp.ne.s32.totalorder %s204_s24, %s1877_s11  ;;  %p1886_p4 = scmp.lt.s32.totalorder %s1877_s11, %s1877_s11 }
  0x17   : > { %p1880_p13 = pnand %p1878_p12, %p1866_p7  ;;  %p1887_p3 = por %p1886_p4, %p1885_p1 }
  0x19   : > { %p1881_p0 = pneg %p1880_p13 }
  0x1b   : > { %p1888_p2 = pnand %p1887_p3, %p1881_p0 }
  0x1d   : > { %1891 = shalt.err (!%p1888_p2)
}
  0x1e   : > { %s1905_s12 = smov 128   ;;  %s1906_s13 = smov 8  }
  0x1f   : > { %1764 = dma.hbm_to_vmem [thread:$0]  (!%p1980_p5), %s2223_s5, 2048, %s204_s24, [#allocation4], %s1905_s12, %s1905_s12, %s1906_s13  }
  0x20   : > { %p2231_p6 = scmp.ne.s32.totalorder %s2228_s25, 0 }
  0x21   : > { %p2232_p8 = scmp.ne.s32.totalorder (!%p2231_p6), %s2229_s26, 0 }
  0x22   : > { %228 = sbr.rel (%p2231_p6) target bundleno = 3147 (0xc4b), region = 44 }
  0x29   : > { %1897 = dma.done.wait (%p2232_p8), [#allocation4], 2048  }
  0x2a   : > { %1899 = vsyncadd (%p2232_p8), [#allocation4], 4294965248  ;;  %s1571_s16 = sshll.u32 %s1564_s22, 2  ;;  %v1794_v0 = vld [vmem:[%s2219_s1] sm:$0xff]   ;;  %v1795_v1 = vld [vmem:[%s2219_s1 + $0x8] sm:$0xff]   ;;  %vm308_vm0 = vcmask 261120  }
  0x2b   : > { %p259_p2 = scmp.lt.s32.totalorder %s1571_s16, 7  ;;  %1645 = vmatprep.subr.bf16.mxu0 %v1794_v0  ;;  %v1907_v4 = vmov 0.0   ;;  %v1575_v6 = vld [vmem:[%s2220_s2] ss:$0 sm:$0xff]  ;;  %vm1908_vm1 = vmmov 0   ;;  %s1909_s28 = smov 96  }
  0x2c   : > { %1646 = vmatpush3.bf16.msra.mxu0 %v1794_v0  ;;  %1653 = vmatprep.subr.bf16.mxu1 %v1907_v4  ;;  %vm369_vm2 = vcmask 64512   ;;  %v467_v20 = vld [vmem:[#allocation3] sm:$0xff]  ;;  %v468_v22 = vld [vmem:[#allocation3 + $0x8] sm:$0xff]  ;;  %vm475_vm3 = vcmask 130048   ;;  %v469_v26 = vld [vmem:[#allocation3 + $0x10] sm:$0xff]  ;;  %s1910_s29 = smov 64  }
  0x2d   : > { %s2234_s16 = smov (!%p259_p2, %s1571_s16), 7  ;;  %1647 = vmatprep.subr.bf16.mxu0 %v1795_v1  ;;  %1655 = vmatprep.mubr.msk.bf16.mxu1 %vm1908_vm1, %v1907_v4  ;;  %v470_v31 = vld [vmem:[#allocation3 + $0x18] sm:$0xff]  ;;  %s1911_s30 = smov 88   ;;  %vm881_vm4 = vcmask 130112   ;;  %vm1145_vm5 = vcmask 195712   ;;  %vm1409_vm6 = vcmask 261312  }
  0x2e   : > { %s1572_s17 = sshll.u32 %s2234_s16, 2  ;;  %s1912_s7 = smov 120  }
  0x2f   : > { %s262_s20 = scalar_lea.vmem %s2218_s0, %s1572_s17  ;;  %s1913_s8 = smov 56  }
  0x30   : > { %v1796_v2 = vld [vmem:[%s262_s20] sm:$0xff]   ;;  %v1797_v3 = vld [vmem:[%s262_s20 + $0x8] sm:$0xff]   ;;  %1648 = vmatpush3.bf16.msra.mxu0 %v1795_v1  ;;  %s1914_s9 = smov 80   ;;  %s1915_s10 = smov 112  }
  0x31   : > { %1649 = vmatprep.mubr.msk.bf16.mxu0 %vm308_vm0, %v1796_v2  ;;  %1659 = vmatprep.subr.bf16.mxu0 %v1907_v4  ;;  %s1916_s11 = smov 48   ;;  %s1917_s12 = smov 72  }
  0x32   : > { %s1918_s13 = smov 104   ;;  %s1919_s14 = smov 40  }
  0x33   : > { %1650 = vmatmul.mubr.msk.bf16.vlgmr.msra.gmra.mrb[0].mxu0 %vm308_vm0, %v1797_v3  ;;  %s1920_s15 = smov 8   ;;  %s1921_s17 = smov 16  }
  0x34   : > { %1661 = vmatprep.mubr.msk.bf16.mxu0 %vm1908_vm1, %v1907_v4  ;;  %s1922_s24 = smov 24   ;;  %s1574_s25 = sshll.u32 %s2234_s16, 3 }
 0x106   : > { %v1651_v5 = vpop.f32.mrb[0].mxu0 }
 0x107   : > { %v349_v7 = vpop.f32.mrb[1].mxu0  ;;  %v358_v9 = vadd.f32 %v1651_v5, %v1575_v6 }
 0x108   : > { %v1652_v8 = vpop.f32.mrb[2].mxu0  ;;  %v350_v12 = vadd.f32 %v1575_v6, %v349_v7 }
 0x109   : > { %v361_v10 = vadd.f32 %v1652_v8, %v1575_v6  ;;  %v352_v11 = vpop.f32.mrb[3].mxu0 }
 0x10a   : > { %v353_v13 = vadd.f32 %v1575_v6, %v352_v11 }
 0x10b   : > { %v2031_v14 = vpack.c.bf16 %v361_v10, %v358_v9 }
 0x10c   : > { %v2033_v15 = vpack.c.bf16 %v353_v13, %v350_v12 }
 0x10e   : > { %367 = vrot.lane.b32.xlu0 %v2033_v15, %s1909_s28 }
 0x112   : > { %418 = vrot.lane.b32.xlu0 %v2031_v14, %s1909_s28 }
 0x180   : > { %v368_v16 = vpop.permute.xlu0 %367 }
 0x181   : > { %v374_v17 = vsel %vm369_vm2, %v368_v16, 0 }
 0x182   : > { %1654 = vmatpush3.bf16.xpose.msra.mxu1 %v374_v17 }
 0x183   : > { %1665 = vmatprep.subr.bf16.mxu1 %v1907_v4 }
 0x184   : > { %v419_v18 = vpop.permute.xlu0 %418 }
 0x185   : > { %v424_v19 = vsel %vm369_vm2, %v419_v18, 0 }
 0x186   : > { %1660 = vmatpush3.bf16.xpose.msra.mxu0 %v424_v19 }
 0x187   : > { %1671 = vmatprep.subr.bf16.mxu0 %v1907_v4 }
 0x189   : > { %1656 = vmatmul.mubr.msk.bf16.vlgmr.msra.gmra.mrb[0].mxu1 %vm369_vm2, %v2033_v15 }
 0x18a   : > { %1667 = vmatprep.mubr.msk.bf16.mxu1 %vm1908_vm1, %v1907_v4 }
 0x18d   : > { %1662 = vmatmul.mubr.msk.bf16.vlgmr.msra.gmra.mrb[4].mxu0 %vm369_vm2, %v2031_v14 }
 0x18e   : > { %1673 = vmatprep.mubr.msk.bf16.mxu0 %vm1908_vm1, %v1907_v4 }
 0x25c   : > { %v410_v21 = vpop.f32.mrb[0].mxu1 }
 0x25d   : > { %v471_v23 = vadd.f32 %v467_v20, %v410_v21  ;;  %v1657_v24 = vpop.f32.mrb[1].mxu1 }
 0x25e   : > { %v413_v25 = vpop.f32.mrb[2].mxu1 }
 0x25f   : > { %v472_v27 = vadd.f32 %v468_v22, %v413_v25  ;;  %v1658_v28 = vpop.f32.mrb[3].mxu1  ;;  %v476_v29 = vsel %vm475_vm3, %v471_v23, -inf }
 0x260   : > { %477 = vmax.xlane.f32.xlu1 %v476_v29  ;;  %v460_v30 = vpop.f32.mrb[4].mxu0 }
 0x261   : > { %v473_v32 = vadd.f32 %v469_v26, %v460_v30  ;;  %v1663_v33 = vpop.f32.mrb[5].mxu0  ;;  %v479_v37 = vsel %vm475_vm3, %v472_v27, -inf }
 0x262   : > { %v463_v34 = vpop.f32.mrb[6].mxu0 }
 0x263   : > { %v474_v35 = vadd.f32 %v470_v31, %v463_v34  ;;  %v1664_v36 = vpop.f32.mrb[7].mxu0  ;;  %v482_v38 = vsel %vm475_vm3, %v473_v32, -inf  ;;  %v723_v34 = vld [vmem:[#allocation3 + $0x20] sm:$0xff] }
 0x264   : > { %480 = vmax.xlane.f32.xlu1 %v479_v37  ;;  %483 = vmax.xlane.f32.xlu0 %v482_v38  ;;  %v725_v36 = vld [vmem:[#allocation3 + $0x30] sm:$0xff]  ;;  %v724_v38 = vld [vmem:[#allocation3 + $0x28] sm:$0xff] }
 0x265   : > { %v485_v39 = vsel %vm475_vm3, %v474_v35, -inf }
 0x268   : > { %486 = vmax.xlane.f32.xlu1 %v485_v39 }
 0x279   : > { %522 = vrot.lane.b32.xlu1 %v2033_v15, %s1910_s29 }
 0x27a   : > { %569 = vrot.lane.b32.xlu0 %v2031_v14, %s1910_s29  ;;  %s268_s29 = scalar_lea.vmem %s2224_s6, %s1574_s25 }
 0x27d   : > { %622 = vrot.lane.b32.xlu1 %v2033_v15, %s1911_s30 }
 0x281   : > { %673 = vrot.lane.b32.xlu1 %v2031_v14, %s1911_s30 }
 0x2ed   : > { %v478_v40 = vpop.xlane.xlu1 %477 }
 0x2ee   : > { %v488_v41 = vsub.f32 %v471_v23, %v478_v40 }
 0x2f0   : > { %v492_v46 = vmul.f32 1.442695, %v488_v41 }
 0x2f1   : > { %v481_v42 = vpop.xlane.xlu1 %480  ;;  %v484_v43 = vpop.xlane.xlu0 %483 }
 0x2f2   : > { %v490_v44 = vsub.f32 %v473_v32, %v484_v43  ;;  %v489_v50 = vsub.f32 %v472_v27, %v481_v42 }
 0x2f4   : > { %v496_v45 = vmul.f32 1.442695, %v490_v44  ;;  %v494_v53 = vmul.f32 1.442695, %v489_v50 }
 0x2f5   : > { %v570_v47 = vpop.permute.xlu0 %569  ;;  %v487_v48 = vpop.xlane.xlu1 %486 }
 0x2f6   : > { %v491_v49 = vsub.f32 %v474_v35, %v487_v48  ;;  %1672 = vmatpush3.bf16.msra.mxu0 %v570_v47  ;;  %1800 = vpow2.f32 %v496_v45 }
 0x2f7   : > { %1683 = vmatprep.subr.bf16.mxu0 %v1907_v4  ;;  %1802 = vpow2.f32 %v492_v46  ;;  %v726_v46 = vld [vmem:[#allocation3 + $0x38] sm:$0xff] }
 0x2f8   : > { %v498_v51 = vmul.f32 1.442695, %v491_v49 }
 0x2f9   : > { %v523_v52 = vpop.permute.xlu1 %522 }
 0x2fa   : > { %1666 = vmatpush3.bf16.msra.mxu1 %v523_v52  ;;  %1804 = vpow2.f32 %v498_v51 }
 0x2fb   : > { %1677 = vmatprep.subr.bf16.mxu1 %v1907_v4  ;;  %1806 = vpow2.f32 %v494_v53 }
 0x2fd   : > { %v623_v62 = vpop.permute.xlu1 %622 }
 0x2fe   : > { %v628_v19 = vsel %vm369_vm2, %v623_v62, 0 }
 0x300   : > { %v1801_v54 = vpop.eup %1800 }
 0x301   : > { %v506_v55 = vsel %vm475_vm3, %v1801_v54, 0.0  ;;  %v1803_v56 = vpop.eup %1802  ;;  %v674_v63 = vpop.permute.xlu1 %673 }
 0x302   : > { %507 = vadd.xlane.f32.xlu1 %v506_v55  ;;  %v500_v57 = vsel %vm475_vm3, %v1803_v56, 0.0  ;;  %v679_v12 = vsel %vm369_vm2, %v674_v63, 0 }
 0x304   : > { %v1805_v58 = vpop.eup %1804 }
 0x305   : > { %v509_v59 = vsel %vm475_vm3, %v1805_v58, 0.0  ;;  %v1807_v60 = vpop.eup %1806 }
 0x306   : > { %501 = vadd.xlane.f32.xlu1 %v500_v57  ;;  %v503_v61 = vsel %vm475_vm3, %v1807_v60, 0.0 }
 0x30a   : > { %510 = vadd.xlane.f32.xlu1 %v509_v59 }
 0x30e   : > { %504 = vadd.xlane.f32.xlu1 %v503_v61 }
 0x31f   : > { %620 = vrot.lane.b32.xlu1 %v2033_v15, %s1912_s7 }
 0x323   : > { %671 = vrot.lane.b32.xlu1 %v2031_v14, %s1912_s7 }
 0x38f   : > { %v508_v0 = vpop.xlane.xlu1 %507 }
 0x390   : > { %1808 = vrcp.f32 %v508_v0 }
 0x393   : > { %v502_v1 = vpop.xlane.xlu1 %501 }
 0x397   : > { %v511_v2 = vpop.xlane.xlu1 %510 }
 0x398   : > { %1810 = vrcp.f32 %v511_v2 }
 0x399   : > { %1812 = vrcp.f32 %v502_v1 }
 0x39a   : > { %v1809_v5 = vpop.eup %1808 }
 0x39b   : > { %v505_v3 = vpop.xlane.xlu1 %504  ;;  %v518_v7 = vmul.f32 %v1809_v5, %v1801_v54 }
 0x39c   : > { %1814 = vrcp.f32 %v505_v3 }
 0x39f   : > { %v621_v17 = vpop.permute.xlu1 %620 }
 0x3a2   : > { %v1811_v6 = vpop.eup %1810 }
 0x3a3   : > { %v519_v8 = vmul.f32 %v1811_v6, %v1805_v58  ;;  %v1813_v9 = vpop.eup %1812  ;;  %v672_v20 = vpop.permute.xlu1 %671 }
 0x3a4   : > { %v516_v13 = vmul.f32 %v1813_v9, %v1803_v56 }
 0x3a5   : > { %v521_v10 = vpack.c.bf16 %v519_v8, %v518_v7 }
 0x3a6   : > { %v1815_v11 = vpop.eup %1814 }
 0x3a7   : > { %v517_v16 = vmul.f32 %v1815_v11, %v1807_v60  ;;  %1674 = vmatmul.mubr.msk.bf16.vlgmr.msra.gmra.mrb[8].mxu0 %vm475_vm3, %v521_v10 }
 0x3a8   : > { %1684 = vmatpush3.bf16.xpose.msra.mxu0 %v679_v12  ;;  %1685 = vmatprep.mubr.msk.bf16.mxu0 %vm1908_vm1, %v1907_v4 }
 0x3a9   : > { %v520_v18 = vpack.c.bf16 %v517_v16, %v516_v13  ;;  %1695 = vmatprep.subr.bf16.mxu0 %v1907_v4 }
 0x3ab   : > { %1668 = vmatmul.mubr.msk.bf16.vlgmr.msra.gmra.mrb[4].mxu1 %vm475_vm3, %v520_v18 }
 0x3ac   : > { %1678 = vmatpush3.bf16.xpose.msra.mxu1 %v628_v19  ;;  %1679 = vmatprep.mubr.msk.bf16.mxu1 %vm1908_vm1, %v1907_v4 }
 0x3ad   : > { %1689 = vmatprep.subr.bf16.mxu1 %v1907_v4 }
 0x3af   : > { %1686 = vmatmul.mubr.msk.bf16.vlgmr.msra.gmra.mrb[12].mxu0 %vm369_vm2, %v672_v20 }
 0x3b0   : > { %1697 = vmatprep.mubr.msk.bf16.mxu0 %vm1908_vm1, %v1907_v4 }
 0x3b3   : > { %1680 = vmatmul.mubr.msk.bf16.vlgmr.msra.gmra.mrb[8].mxu1 %vm369_vm2, %v621_v17 }
 0x3b4   : > { %1691 = vmatprep.mubr.msk.bf16.mxu1 %vm1908_vm1, %v1907_v4 }
 0x47a   : > { %v609_v21 = vpop.f32.mrb[8].mxu0 }
 0x47b   : > { %v1675_v22 = vpop.f32.mrb[9].mxu0 }
 0x47c   : > { %v612_v23 = vpop.f32.mrb[10].mxu0 }
 0x47d   : > { %v617_v24 = vpack.c.bf16 %v612_v23, %v609_v21  ;;  %v1676_v25 = vpop.f32.mrb[11].mxu0 }
 0x47e   : > { %v562_v26 = vpop.f32.mrb[4].mxu1 }
 0x47f   : > { %619 = vst.msk [vmem:[#allocation2 + $0x8] sm:$0xff] %vm369_vm2, %v617_v24  ;;  %v1669_v27 = vpop.f32.mrb[5].mxu1 }
 0x480   : > { %v565_v28 = vpop.f32.mrb[6].mxu1 }
 0x481   : > { %v616_v29 = vpack.c.bf16 %v565_v28, %v562_v26  ;;  %v1670_v30 = vpop.f32.mrb[7].mxu1 }
 0x482   : > { %v715_v31 = vpop.f32.mrb[12].mxu0 }
 0x483   : > { %618 = vst.msk [vmem:[#allocation2] sm:$0xff] %vm369_vm2, %v616_v29  ;;  %v1687_v32 = vpop.f32.mrb[13].mxu0  ;;  %v729_v42 = vadd.f32 %v725_v36, %v715_v31 }
 0x484   : > { %v718_v33 = vpop.f32.mrb[14].mxu0 }
 0x485   : > { %v1688_v35 = vpop.f32.mrb[15].mxu0  ;;  %v730_v48 = vadd.f32 %v726_v46, %v718_v33  ;;  %v737_v49 = vsel %vm475_vm3, %v729_v42, -inf  ;;  %v989_v46 = vld [vmem:[#allocation3 + $0x50] sm:$0xff] }
 0x486   : > { %v664_v37 = vpop.f32.mrb[8].mxu1 }
 0x487   : > { %v727_v39 = vadd.f32 %v723_v34, %v664_v37  ;;  %v1681_v40 = vpop.f32.mrb[9].mxu1  ;;  %v740_v50 = vsel %vm475_vm3, %v730_v48, -inf }
 0x488   : > { %v667_v41 = vpop.f32.mrb[10].mxu1 }
 0x489   : > { %v728_v43 = vadd.f32 %v724_v38, %v667_v41  ;;  %v1682_v44 = vpop.f32.mrb[11].mxu1  ;;  %v731_v45 = vsel %vm475_vm3, %v727_v39, -inf }
 0x48a   : > { %732 = vmax.xlane.f32.xlu0 %v731_v45  ;;  %v987_v44 = vld [vmem:[#allocation3 + $0x40] sm:$0xff] }
 0x48b   : > { %v734_v47 = vsel %vm475_vm3, %v728_v43, -inf }
 0x48c   : > { %735 = vmax.xlane.f32.xlu1 %v734_v47 }
 0x48e   : > { %738 = vmax.xlane.f32.xlu0 %v737_v49  ;;  %v988_v49 = vld [vmem:[#allocation3 + $0x48] sm:$0xff] }
 0x492   : > { %741 = vmax.xlane.f32.xlu0 %v740_v50 }
 0x49d   : > { %777 = vrot.lane.b32.xlu1 %v2033_v15, %s1913_s8 }
 0x517   : > { %v733_v51 = vpop.xlane.xlu0 %732 }
 0x518   : > { %v743_v53 = vsub.f32 %v727_v39, %v733_v51 }
 0x519   : > { %v736_v52 = vpop.xlane.xlu1 %735 }
 0x51a   : > { %v747_v57 = vmul.f32 1.442695, %v743_v53  ;;  %v744_v58 = vsub.f32 %v728_v43, %v736_v52 }
 0x51b   : > { %v739_v54 = vpop.xlane.xlu0 %738 }
 0x51c   : > { %v745_v55 = vsub.f32 %v729_v42, %v739_v54  ;;  %v749_v62 = vmul.f32 1.442695, %v744_v58 }
 0x51d   : > { %v778_v56 = vpop.permute.xlu1 %777 }
 0x51e   : > { %v751_v59 = vmul.f32 1.442695, %v745_v55  ;;  %1690 = vmatpush3.bf16.msra.mxu1 %v778_v56 }
 0x51f   : > { %v742_v60 = vpop.xlane.xlu0 %741  ;;  %1701 = vmatprep.subr.bf16.mxu1 %v1907_v4 }
 0x520   : > { %1816 = vpow2.f32 %v751_v59  ;;  %v746_v61 = vsub.f32 %v730_v48, %v742_v60 }
 0x521   : > { %1818 = vpow2.f32 %v747_v57  ;;  %v990_v57 = vld [vmem:[#allocation3 + $0x58] sm:$0xff] }
 0x522   : > { %v753_v63 = vmul.f32 1.442695, %v746_v61 }
 0x524   : > { %1820 = vpow2.f32 %v753_v63 }
 0x525   : > { %1822 = vpow2.f32 %v749_v62 }
 0x52a   : > { %v1817_v0 = vpop.eup %1816 }
 0x52b   : > { %v761_v1 = vsel %vm475_vm3, %v1817_v0, 0.0  ;;  %v1819_v2 = vpop.eup %1818 }
 0x52c   : > { %762 = vadd.xlane.f32.xlu1 %v761_v1  ;;  %v755_v5 = vsel %vm475_vm3, %v1819_v2, 0.0 }
 0x52e   : > { %v1821_v3 = vpop.eup %1820 }
 0x52f   : > { %v764_v6 = vsel %vm475_vm3, %v1821_v3, 0.0  ;;  %v1823_v7 = vpop.eup %1822 }
 0x530   : > { %756 = vadd.xlane.f32.xlu1 %v755_v5  ;;  %765 = vadd.xlane.f32.xlu0 %v764_v6  ;;  %v758_v8 = vsel %vm475_vm3, %v1823_v7, 0.0 }
 0x534   : > { %759 = vadd.xlane.f32.xlu0 %v758_v8 }
 0x541   : > { %886 = vrot.lane.b32.xlu1 %v2033_v15, %s1914_s9 }
 0x545   : > { %937 = vrot.lane.b32.xlu1 %v2031_v14, %s1914_s9 }
 0x549   : > { %935 = vrot.lane.b32.xlu1 %v2031_v14, %s1915_s10 }
 0x54a   : > { %824 = vrot.lane.b32.xlu0 %v2031_v14, %s1913_s8 }
 0x54e   : > { %884 = vrot.lane.b32.xlu0 %v2033_v15, %s1915_s10 }
 0x5b9   : > { %v763_v9 = vpop.xlane.xlu1 %762 }
 0x5ba   : > { %1824 = vrcp.f32 %v763_v9 }
 0x5bd   : > { %v757_v10 = vpop.xlane.xlu1 %756  ;;  %v766_v11 = vpop.xlane.xlu0 %765 }
 0x5be   : > { %1826 = vrcp.f32 %v766_v11 }
 0x5bf   : > { %1828 = vrcp.f32 %v757_v10 }
 0x5c1   : > { %v760_v12 = vpop.xlane.xlu0 %759  ;;  %v887_v13 = vpop.permute.xlu1 %886 }
 0x5c2   : > { %1830 = vrcp.f32 %v760_v12  ;;  %v892_v29 = vsel %vm369_vm2, %v887_v13, 0 }
 0x5c4   : > { %v1825_v17 = vpop.eup %1824 }
 0x5c5   : > { %v825_v16 = vpop.permute.xlu0 %824  ;;  %v773_v20 = vmul.f32 %v1825_v17, %v1817_v0  ;;  %v938_v22 = vpop.permute.xlu1 %937 }
 0x5c6   : > { %1696 = vmatpush3.bf16.msra.mxu0 %v825_v16  ;;  %v943_v27 = vsel %vm369_vm2, %v938_v22, 0 }
 0x5c7   : > { %1707 = vmatprep.subr.bf16.mxu0 %v1907_v4 }
 0x5c8   : > { %v1827_v18 = vpop.eup %1826 }
 0x5c9   : > { %v1829_v19 = vpop.eup %1828  ;;  %v774_v21 = vmul.f32 %v1827_v18, %v1821_v3  ;;  %v936_v30 = vpop.permute.xlu1 %935 }
 0x5ca   : > { %v771_v25 = vmul.f32 %v1829_v19, %v1819_v2  ;;  %v885_v31 = vpop.permute.xlu0 %884 }
 0x5cb   : > { %v776_v24 = vpack.c.bf16 %v774_v21, %v773_v20 }
 0x5cc   : > { %v1831_v23 = vpop.eup %1830 }
 0x5cd   : > { %v772_v26 = vmul.f32 %v1831_v23, %v1823_v7  ;;  %1698 = vmatmul.mubr.msk.bf16.vlgmr.msra.gmra.mrb[16].mxu0 %vm475_vm3, %v776_v24 }
 0x5ce   : > { %1709 = vmatprep.mubr.msk.bf16.mxu0 %vm1908_vm1, %v1907_v4 }
 0x5cf   : > { %1708 = vmatpush3.bf16.xpose.msra.mxu0 %v943_v27  ;;  %v775_v28 = vpack.c.bf16 %v772_v26, %v771_v25 }
 0x5d0   : > { %1719 = vmatprep.subr.bf16.mxu0 %v1907_v4 }
 0x5d1   : > { %1692 = vmatmul.mubr.msk.bf16.vlgmr.msra.gmra.mrb[12].mxu1 %vm475_vm3, %v775_v28 }
 0x5d2   : > { %1702 = vmatpush3.bf16.xpose.msra.mxu1 %v892_v29  ;;  %1703 = vmatprep.mubr.msk.bf16.mxu1 %vm1908_vm1, %v1907_v4 }
 0x5d3   : > { %1713 = vmatprep.subr.bf16.mxu1 %v1907_v4 }
 0x5d6   : > { %1710 = vmatmul.mubr.msk.bf16.vlgmr.msra.gmra.mrb[20].mxu0 %vm369_vm2, %v936_v30 }
 0x5d7   : > { %1721 = vmatprep.mubr.msk.bf16.mxu0 %vm1908_vm1, %v1907_v4 }
 0x5d9   : > { %1704 = vmatmul.mubr.msk.bf16.vlgmr.msra.gmra.mrb[16].mxu1 %vm369_vm2, %v885_v31 }
 0x5da   : > { %1715 = vmatprep.mubr.msk.bf16.mxu1 %vm1908_vm1, %v1907_v4 }
 0x6a0   : > { %v2117_v32 = vpop.f32.mrb[16].mxu0 }
 0x6a1   : > { %v1699_v33 = vpop.f32.mrb[17].mxu0 }
 0x6a2   : > { %v2119_v34 = vpop.f32.mrb[18].mxu0 }
 0x6a3   : > { %v872_v35 = vpack.c.bf16 %v2119_v34, %v2117_v32  ;;  %v1700_v36 = vpop.f32.mrb[19].mxu0 }
 0x6a4   : > { %v2123_v37 = vpop.f32.mrb[12].mxu1 }
 0x6a5   : > { %v1693_v38 = vpop.f32.mrb[13].mxu1 }
 0x6a6   : > { %v2125_v39 = vpop.f32.mrb[14].mxu1 }
 0x6a7   : > { %v871_v40 = vpack.c.bf16 %v2125_v39, %v2123_v37  ;;  %v1694_v41 = vpop.f32.mrb[15].mxu1 }
 0x6a9   : > { %v979_v42 = vpop.f32.mrb[20].mxu0 }
 0x6aa   : > { %v1711_v43 = vpop.f32.mrb[21].mxu0  ;;  %v993_v53 = vadd.f32 %v989_v46, %v979_v42 }
 0x6ab   : > { %v982_v45 = vpop.f32.mrb[22].mxu0 }
 0x6ac   : > { %v928_v47 = vpop.f32.mrb[16].mxu1  ;;  %v1712_v48 = vpop.f32.mrb[23].mxu0  ;;  %v994_v59 = vadd.f32 %v990_v57, %v982_v45  ;;  %v1001_v60 = vsel %vm475_vm3, %v993_v53, -inf }
 0x6ad   : > { %v991_v50 = vadd.f32 %v987_v44, %v928_v47  ;;  %v1705_v51 = vpop.f32.mrb[17].mxu1 }
 0x6ae   : > { %v931_v52 = vpop.f32.mrb[18].mxu1  ;;  %v1004_v61 = vsel %vm475_vm3, %v994_v59, -inf }
 0x6af   : > { %v992_v54 = vadd.f32 %v988_v49, %v931_v52  ;;  %v1706_v55 = vpop.f32.mrb[19].mxu1  ;;  %v995_v56 = vsel %vm475_vm3, %v991_v50, -inf }
 0x6b0   : > { %996 = vmax.xlane.f32.xlu0 %v995_v56 }
 0x6b1   : > { %v998_v58 = vsel %vm475_vm3, %v992_v54, -inf }
 0x6b2   : > { %999 = vmax.xlane.f32.xlu1 %v998_v58 }
 0x6b4   : > { %1002 = vmax.xlane.f32.xlu0 %v1001_v60  ;;  %v1251_v60 = vld [vmem:[#allocation3 + $0x60] sm:$0xff] }
 0x6b8   : > { %1005 = vmax.xlane.f32.xlu0 %v1004_v61 }
 0x6c3   : > { %1041 = vrot.lane.b32.xlu1 %v2033_v15, %s1916_s11 }
 0x73d   : > { %v997_v62 = vpop.xlane.xlu0 %996 }
 0x73e   : > { %v1007_v0 = vsub.f32 %v991_v50, %v997_v62  ;;  %v1253_v62 = vld [vmem:[#allocation3 + $0x70] sm:$0xff] }
 0x73f   : > { %v1000_v63 = vpop.xlane.xlu1 %999 }
 0x740   : > { %v1011_v5 = vmul.f32 1.442695, %v1007_v0  ;;  %v1008_v6 = vsub.f32 %v992_v54, %v1000_v63 }
 0x741   : > { %v1003_v1 = vpop.xlane.xlu0 %1002 }
 0x742   : > { %v1009_v2 = vsub.f32 %v993_v53, %v1003_v1  ;;  %v1013_v10 = vmul.f32 1.442695, %v1008_v6  ;;  %v1252_v1 = vld [vmem:[#allocation3 + $0x68] sm:$0xff] }
 0x743   : > { %v1042_v3 = vpop.permute.xlu1 %1041 }
 0x744   : > { %v1015_v7 = vmul.f32 1.442695, %v1009_v2  ;;  %1714 = vmatpush3.bf16.msra.mxu1 %v1042_v3 }
 0x745   : > { %v1006_v8 = vpop.xlane.xlu0 %1005  ;;  %1725 = vmatprep.subr.bf16.mxu1 %v1907_v4 }
 0x746   : > { %1832 = vpow2.f32 %v1015_v7  ;;  %v1010_v9 = vsub.f32 %v994_v59, %v1006_v8 }
 0x747   : > { %1834 = vpow2.f32 %v1011_v5 }
 0x748   : > { %v1017_v11 = vmul.f32 1.442695, %v1010_v9 }
 0x74a   : > { %1836 = vpow2.f32 %v1017_v11 }
 0x74b   : > { %1838 = vpow2.f32 %v1013_v10  ;;  %v1254_v10 = vld [vmem:[#allocation3 + $0x78] sm:$0xff] }
 0x750   : > { %v1833_v12 = vpop.eup %1832 }
 0x751   : > { %v1025_v13 = vsel %vm475_vm3, %v1833_v12, 0.0  ;;  %v1835_v16 = vpop.eup %1834 }
 0x752   : > { %1026 = vadd.xlane.f32.xlu1 %v1025_v13  ;;  %v1019_v18 = vsel %vm475_vm3, %v1835_v16, 0.0 }
 0x754   : > { %v1837_v17 = vpop.eup %1836 }
 0x755   : > { %v1028_v19 = vsel %vm475_vm3, %v1837_v17, 0.0  ;;  %v1839_v20 = vpop.eup %1838 }
 0x756   : > { %1020 = vadd.xlane.f32.xlu1 %v1019_v18  ;;  %1029 = vadd.xlane.f32.xlu0 %v1028_v19  ;;  %v1022_v21 = vsel %vm475_vm3, %v1839_v20, 0.0 }
 0x75a   : > { %1023 = vadd.xlane.f32.xlu0 %v1022_v21 }
 0x767   : > { %1150 = vrot.lane.b32.xlu1 %v2033_v15, %s1917_s12 }
 0x76b   : > { %1201 = vrot.lane.b32.xlu1 %v2031_v14, %s1917_s12 }
 0x76f   : > { %1199 = vrot.lane.b32.xlu1 %v2031_v14, %s1918_s13 }
 0x770   : > { %1088 = vrot.lane.b32.xlu0 %v2031_v14, %s1916_s11 }
 0x774   : > { %1148 = vrot.lane.b32.xlu0 %v2033_v15, %s1918_s13 }
 0x7df   : > { %v1027_v22 = vpop.xlane.xlu1 %1026 }
 0x7e0   : > { %1840 = vrcp.f32 %v1027_v22 }
 0x7e3   : > { %v1021_v23 = vpop.xlane.xlu1 %1020  ;;  %v1030_v24 = vpop.xlane.xlu0 %1029 }
 0x7e4   : > { %1842 = vrcp.f32 %v1030_v24 }
 0x7e5   : > { %1844 = vrcp.f32 %v1021_v23 }
 0x7e7   : > { %v1024_v25 = vpop.xlane.xlu0 %1023  ;;  %v1151_v26 = vpop.permute.xlu1 %1150 }
 0x7e8   : > { %1846 = vrcp.f32 %v1024_v25  ;;  %v1156_v46 = vsel %vm369_vm2, %v1151_v26, 0 }
 0x7ea   : > { %v1841_v28 = vpop.eup %1840 }
 0x7eb   : > { %v1089_v27 = vpop.permute.xlu0 %1088  ;;  %v1037_v31 = vmul.f32 %v1841_v28, %v1833_v12  ;;  %v1202_v36 = vpop.permute.xlu1 %1201 }
 0x7ec   : > { %1720 = vmatpush3.bf16.msra.mxu0 %v1089_v27  ;;  %v1207_v44 = vsel %vm369_vm2, %v1202_v36, 0 }
 0x7ed   : > { %1731 = vmatprep.subr.bf16.mxu0 %v1907_v4 }
 0x7ee   : > { %v1843_v29 = vpop.eup %1842 }
 0x7ef   : > { %v1845_v30 = vpop.eup %1844  ;;  %v1038_v33 = vmul.f32 %v1843_v29, %v1837_v17  ;;  %v1200_v47 = vpop.permute.xlu1 %1199 }
 0x7f0   : > { %v1035_v42 = vmul.f32 %v1845_v30, %v1835_v16  ;;  %v1149_v48 = vpop.permute.xlu0 %1148 }
 0x7f1   : > { %v1040_v41 = vpack.c.bf16 %v1038_v33, %v1037_v31 }
 0x7f2   : > { %v1847_v38 = vpop.eup %1846 }
 0x7f3   : > { %v1036_v43 = vmul.f32 %v1847_v38, %v1839_v20  ;;  %1722 = vmatmul.mubr.msk.bf16.vlgmr.msra.gmra.mrb[24].mxu0 %vm475_vm3, %v1040_v41 }
 0x7f4   : > { %1733 = vmatprep.mubr.msk.bf16.mxu0 %vm1908_vm1, %v1907_v4 }
 0x7f5   : > { %1732 = vmatpush3.bf16.xpose.msra.mxu0 %v1207_v44  ;;  %v1039_v45 = vpack.c.bf16 %v1036_v43, %v1035_v42 }
 0x7f6   : > { %1743 = vmatprep.subr.bf16.mxu0 %v1907_v4 }
 0x7f7   : > { %1716 = vmatmul.mubr.msk.bf16.vlgmr.msra.gmra.mrb[20].mxu1 %vm475_vm3, %v1039_v45 }
 0x7f8   : > { %1726 = vmatpush3.bf16.xpose.msra.mxu1 %v1156_v46  ;;  %1727 = vmatprep.mubr.msk.bf16.mxu1 %vm1908_vm1, %v1907_v4 }
 0x7f9   : > { %1737 = vmatprep.subr.bf16.mxu1 %v1907_v4 }
 0x7fc   : > { %1734 = vmatmul.mubr.msk.bf16.vlgmr.msra.gmra.mrb[28].mxu0 %vm369_vm2, %v1200_v47 }
 0x7fd   : > { %1745 = vmatprep.mubr.msk.bf16.mxu0 %vm1908_vm1, %v1907_v4 }
 0x7ff   : > { %1728 = vmatmul.mubr.msk.bf16.vlgmr.msra.gmra.mrb[24].mxu1 %vm369_vm2, %v1149_v48 }
 0x800   : > { %1739 = vmatprep.mubr.msk.bf16.mxu1 %vm1908_vm1, %v1907_v4 }
 0x8c6   : > { %v2163_v49 = vpop.f32.mrb[24].mxu0 }
 0x8c7   : > { %v1723_v50 = vpop.f32.mrb[25].mxu0 }
 0x8c8   : > { %v2165_v51 = vpop.f32.mrb[26].mxu0 }
 0x8c9   : > { %v1136_v52 = vpack.c.bf16 %v2165_v51, %v2163_v49  ;;  %v1724_v53 = vpop.f32.mrb[27].mxu0 }
 0x8ca   : > { %v2169_v54 = vpop.f32.mrb[20].mxu1 }
 0x8cb   : > { %v1717_v55 = vpop.f32.mrb[21].mxu1 }
 0x8cc   : > { %v2171_v56 = vpop.f32.mrb[22].mxu1  ;;  %v1798_v55 = vld [vmem:[%s2221_s3] sm:$0xff]  }
 0x8cd   : > { %v1135_v57 = vpack.c.bf16 %v2171_v56, %v2169_v54  ;;  %v1718_v58 = vpop.f32.mrb[23].mxu1  ;;  %v1799_v56 = vld [vmem:[%s2221_s3 + $0x8] sm:$0xff]  }
 0x8cf   : > { %v1243_v59 = vpop.f32.mrb[28].mxu0 }
 0x8d0   : > { %v1735_v4 = vpop.f32.mrb[29].mxu0  ;;  %v1257_v6 = vadd.f32 %v1253_v62, %v1243_v59 }
 0x8d1   : > { %v1246_v61 = vpop.f32.mrb[30].mxu0 }
 0x8d2   : > { %v1192_v63 = vpop.f32.mrb[24].mxu1  ;;  %v1736_v0 = vpop.f32.mrb[31].mxu0  ;;  %v1258_v12 = vadd.f32 %v1254_v10, %v1246_v61  ;;  %v1265_v13 = vsel %vm475_vm3, %v1257_v6, -inf }
 0x8d3   : > { %v1255_v2 = vadd.f32 %v1251_v60, %v1192_v63  ;;  %v1729_v3 = vpop.f32.mrb[25].mxu1 }
 0x8d4   : > { %v1195_v5 = vpop.f32.mrb[26].mxu1  ;;  %v1268_v16 = vsel %vm475_vm3, %v1258_v12, -inf }
 0x8d5   : > { %v1256_v7 = vadd.f32 %v1252_v1, %v1195_v5  ;;  %v1730_v8 = vpop.f32.mrb[27].mxu1  ;;  %v1259_v9 = vsel %vm475_vm3, %v1255_v2, -inf }
 0x8d6   : > { %1260 = vmax.xlane.f32.xlu0 %v1259_v9 }
 0x8d7   : > { %v1262_v11 = vsel %vm475_vm3, %v1256_v7, -inf }
 0x8d8   : > { %1263 = vmax.xlane.f32.xlu1 %v1262_v11 }
 0x8da   : > { %1266 = vmax.xlane.f32.xlu0 %v1265_v13 }
 0x8de   : > { %1269 = vmax.xlane.f32.xlu0 %v1268_v16 }
 0x963   : > { %v1261_v17 = vpop.xlane.xlu0 %1260 }
 0x964   : > { %v1271_v18 = vsub.f32 %v1255_v2, %v1261_v17 }
 0x965   : > { %v1264_v19 = vpop.xlane.xlu1 %1263 }
 0x966   : > { %v1275_v22 = vmul.f32 1.442695, %v1271_v18  ;;  %v1272_v23 = vsub.f32 %v1256_v7, %v1264_v19  ;;  %v1598_v7 = vld [vmem:[%s2222_s4] ss:$0 sm:$0xff] }
 0x967   : > { %v1267_v20 = vpop.xlane.xlu0 %1266 }
 0x968   : > { %v1273_v21 = vsub.f32 %v1257_v6, %v1267_v20  ;;  %v1277_v27 = vmul.f32 1.442695, %v1272_v23 }
 0x96a   : > { %v1279_v24 = vmul.f32 1.442695, %v1273_v21 }
 0x96b   : > { %v1270_v25 = vpop.xlane.xlu0 %1269 }
 0x96c   : > { %1848 = vpow2.f32 %v1279_v24  ;;  %v1274_v26 = vsub.f32 %v1258_v12, %v1270_v25 }
 0x96d   : > { %1850 = vpow2.f32 %v1275_v22 }
 0x96e   : > { %v1281_v28 = vmul.f32 1.442695, %v1274_v26 }
 0x970   : > { %1852 = vpow2.f32 %v1281_v28 }
 0x971   : > { %1854 = vpow2.f32 %v1277_v27 }
 0x976   : > { %v1849_v29 = vpop.eup %1848 }
 0x977   : > { %v1289_v30 = vsel %vm475_vm3, %v1849_v29, 0.0  ;;  %v1851_v31 = vpop.eup %1850 }
 0x978   : > { %1290 = vadd.xlane.f32.xlu1 %v1289_v30  ;;  %v1283_v36 = vsel %vm475_vm3, %v1851_v31, 0.0 }
 0x97a   : > { %v1853_v33 = vpop.eup %1852 }
 0x97b   : > { %v1292_v38 = vsel %vm475_vm3, %v1853_v33, 0.0  ;;  %v1855_v41 = vpop.eup %1854 }
 0x97c   : > { %1284 = vadd.xlane.f32.xlu1 %v1283_v36  ;;  %1293 = vadd.xlane.f32.xlu0 %v1292_v38  ;;  %v1286_v42 = vsel %vm475_vm3, %v1855_v41, 0.0 }
 0x980   : > { %1287 = vadd.xlane.f32.xlu0 %v1286_v42 }
 0x98d   : > { %1305 = vrot.lane.b32.xlu1 %v2033_v15, %s1919_s14 }
 0x991   : > { %875 = vrot.lane.b32.xlu1 %v871_v40, %s1920_s15 }
 0x995   : > { %877 = vrot.lane.b32.xlu1 %v872_v35, %s1920_s15 }
 0x996   : > { %1352 = vrot.lane.b32.xlu0 %v2031_v14, %s1919_s14 }
 0x999   : > { %1141 = vrot.lane.b32.xlu1 %v1136_v52, %s1921_s17 }
 0x99a   : > { %1139 = vrot.lane.b32.xlu0 %v1135_v57, %s1921_s17 }
 0xa05   : > { %v1291_v43 = vpop.xlane.xlu1 %1290 }
 0xa06   : > { %1856 = vrcp.f32 %v1291_v43 }
 0xa09   : > { %v1285_v15 = vpop.xlane.xlu1 %1284  ;;  %v1294_v44 = vpop.xlane.xlu0 %1293 }
 0xa0a   : > { %1858 = vrcp.f32 %v1294_v44 }
 0xa0b   : > { %1860 = vrcp.f32 %v1285_v15 }
 0xa0d   : > { %v1306_v37 = vpop.permute.xlu1 %1305  ;;  %v1288_v39 = vpop.xlane.xlu0 %1287 }
 0xa0e   : > { %1862 = vrcp.f32 %v1288_v39  ;;  %1738 = vmatpush3.bf16.msra.mxu1 %v1306_v37 }
 0xa0f   : > { %1749 = vmatprep.subr.bf16.mxu1 %v1798_v55 }
 0xa10   : > { %v1857_v14 = vpop.eup %1856 }
 0xa11   : > { %v876_v32 = vpop.permute.xlu1 %875  ;;  %v1353_v34 = vpop.permute.xlu0 %1352  ;;  %v1301_v47 = vmul.f32 %v1857_v14, %v1849_v29 }
 0xa12   : > { %882 = vst.msk [vmem:[#allocation2] sm:$0xff] %vm881_vm4, %v876_v32  ;;  %1744 = vmatpush3.bf16.msra.mxu0 %v1353_v34 }
 0xa14   : > { %v1859_v35 = vpop.eup %1858 }
 0xa15   : > { %v878_v40 = vpop.permute.xlu1 %877  ;;  %v1140_v45 = vpop.permute.xlu0 %1139  ;;  %v1302_v48 = vmul.f32 %v1859_v35, %v1853_v33 }
 0xa16   : > { %v1861_v46 = vpop.eup %1860  ;;  %883 = vst.msk [vmem:[#allocation2 + $0x8] sm:$0xff] %vm881_vm4, %v878_v40 }
 0xa17   : > { %1146 = vst.msk [vmem:[#allocation2] sm:$0xff] %vm1145_vm5, %v1140_v45  ;;  %v1304_v50 = vpack.c.bf16 %v1302_v48, %v1301_v47  ;;  %v1299_v51 = vmul.f32 %v1861_v46, %v1851_v31 }
 0xa18   : > { %v1863_v49 = vpop.eup %1862 }
 0xa19   : > { %v1300_v52 = vmul.f32 %v1863_v49, %v1855_v41  ;;  %v1142_v53 = vpop.permute.xlu1 %1141  ;;  %1746 = vmatmul.mubr.msk.bf16.vlgmr.msra.gmra.mrb[32].mxu0 %vm475_vm3, %v1304_v50 }
 0xa1a   : > { %1147 = vst.msk [vmem:[#allocation2 + $0x8] sm:$0xff] %vm1145_vm5, %v1142_v53 }
 0xa1b   : > { %v1303_v54 = vpack.c.bf16 %v1300_v52, %v1299_v51 }
 0xa1d   : > { %1740 = vmatmul.mubr.msk.bf16.vlgmr.msra.gmra.mrb[28].mxu1 %vm475_vm3, %v1303_v54 }
 0xa1e   : > { %1750 = vmatpush3.bf16.msra.mxu1 %v1798_v55 }
 0xa1f   : > { %1751 = vmatprep.subr.bf16.mxu1 %v1799_v56 }
 0xa22   : > { %1752 = vmatpush3.bf16.msra.mxu1 %v1799_v56 }
 0xaec   : > { %v1392_v57 = vpop.f32.mrb[32].mxu0 }
 0xaed   : > { %v1747_v58 = vpop.f32.mrb[33].mxu0 }
 0xaee   : > { %v1395_v59 = vpop.f32.mrb[34].mxu0 }
 0xaef   : > { %v1400_v4 = vpack.c.bf16 %v1395_v59, %v1392_v57  ;;  %v1748_v60 = vpop.f32.mrb[35].mxu0 }
 0xaf0   : > { %v1345_v61 = vpop.f32.mrb[28].mxu1 }
 0xaf1   : > { %v1741_v62 = vpop.f32.mrb[29].mxu1  ;;  %1405 = vrot.lane.b32.xlu1 %v1400_v4, %s1922_s24 }
 0xaf2   : > { %v1348_v63 = vpop.f32.mrb[30].mxu1 }
 0xaf3   : > { %v1399_v0 = vpack.c.bf16 %v1348_v63, %v1345_v61  ;;  %v1742_v1 = vpop.f32.mrb[31].mxu1 }
 0xaf5   : > { %1403 = vrot.lane.b32.xlu0 %v1399_v0, %s1922_s24 }
 0xb63   : > { %v1406_v2 = vpop.permute.xlu1 %1405 }
 0xb64   : > { %1411 = vst.msk [vmem:[#allocation2 + $0x8] sm:$0xff] %vm1409_vm6, %v1406_v2 }
 0xb67   : > { %v1404_v3 = vpop.permute.xlu0 %1403 }
 0xb68   : > { %1410 = vst.msk [vmem:[#allocation2] sm:$0xff] %vm1409_vm6, %v1404_v3 }
 0xb6b   : > { %v1413_v6 = vld [vmem:[#allocation2 + $0x8] sm:$0xff] }
 0xb6f   : > { %v1412_v5 = vld [vmem:[#allocation2] sm:$0xff] }
 0xb70   : > { %1753 = vmatprep.mubr.msk.bf16.mxu1 %vm308_vm0, %v1412_v5 }
 0xb71   : > { %1754 = vmatmul.mubr.msk.bf16.vlgmr.msra.gmra.mrb[32].mxu1 %vm308_vm0, %v1413_v6 }
 0xc44   : > { %v1755_v8 = vpop.f32.mrb[32].mxu1 }
 0xc45   : > { %v1477_v9 = vpop.f32.mrb[33].mxu1  ;;  %v1486_v16 = vadd.f32 %v1755_v8, %v1598_v7 }
 0xc46   : > { %v1478_v10 = vadd.f32 %v1598_v7, %v1477_v9  ;;  %v1756_v11 = vpop.f32.mrb[34].mxu1 }
 0xc47   : > { %v1480_v12 = vpop.f32.mrb[35].mxu1  ;;  %v1489_v17 = vadd.f32 %v1756_v11, %v1598_v7  ;;  %1494 = vst.msk [vmem:[%s268_s29 + $0x10] sm:$0xff] %vm308_vm0, %v1486_v16 }
 0xc48   : > { %1492 = vst.msk [vmem:[%s268_s29] sm:$0xff] %vm308_vm0, %v1478_v10  ;;  %v1481_v13 = vadd.f32 %v1598_v7, %v1480_v12 }
 0xc49   : > { %1495 = vst.msk [vmem:[%s268_s29 + $0x18] sm:$0xff] %vm308_vm0, %v1489_v17 }
 0xc4a   : > { %1493 = vst.msk [vmem:[%s268_s29 + $0x8] sm:$0xff] %vm308_vm0, %v1481_v13 }
 0xc4b PF: > { %s17_s21 = sadd.s32 1, %s1902_s21  }
 0xc4c   : > { %p14_p3 = scmp.ge.s32.totalorder %s17_s21, 4  }
 0xc4e   :  { %16 = sbr.rel (!%p14_p3) target bundleno = 1 (0x1), region = 82 }
 0xc55   :  { %1518 = vsyncpa [#allocation4], 1 }
 0xc56   :  { %1520 = vsyncpa [#allocation4 + $0x1], 1 }

</bundles_post_ra>
